<compile_context>
chip_gen: v5e
topology: v5e:2x2
jax: 0.10.0
libtpu: 0.0.40
codegen_flags: <defaults>
</compile_context>

<pallas_src>
import math
import functools

import jax
import jax.numpy as jnp
from jax import lax
from jax.experimental import pallas as pl
from jax.experimental.pallas import tpu as pltpu

_MIB = 1024 * 1024


# ----------------------------------------------------------------------------
# Parameter / buffer setup (plain JAX glue, mirrors PositionalEncoding.__init__)
# ----------------------------------------------------------------------------
def make_pe_buffer(max_len: int, d_model: int, dtype=jnp.float32):
    position = jnp.arange(max_len, dtype=jnp.float32)[:, None]            # (max_len, 1)
    div_term = jnp.exp(
        jnp.arange(0, d_model, 2, dtype=jnp.float32) * (-math.log(10000.0) / d_model)
    )                                                                      # (d_model//2,)
    pe = jnp.zeros((max_len, d_model), dtype=jnp.float32)
    pe = pe.at[:, 0::2].set(jnp.sin(position * div_term))
    pe = pe.at[:, 1::2].set(jnp.cos(position * div_term))
    # torch: pe.unsqueeze(0).transpose(0, 1) -> (max_len, 1, d_model)
    return pe[:, None, :].astype(dtype)


# ----------------------------------------------------------------------------
# In-kernel dropout helpers (counter-based hash PRNG; portable, no HW PRNG)
# ----------------------------------------------------------------------------
def _hash32(x):
    """lowbias32 integer hash — pure 32-bit VPU ops (xor/shift/mul)."""
    x = x ^ (x >> 16)
    x = x * jnp.uint32(0x7FEB352D)
    x = x ^ (x >> 15)
    x = x * jnp.uint32(0x846CA68B)
    x = x ^ (x >> 16)
    return x


def _keep_mask(shape, row_off_u32, seed_u32, p):
    """Per-element keep mask with P(keep) = (2^32 - round(p*2^32)) / 2^32 ~= 1-p.

    Each element is numbered by its global flat index in the full output array
    (axis 0 of the tile is the sequence axis, offset by row_off), so every
    element in every grid step / batch column draws an independent bit and the
    mask never repeats across tiles.
    """
    inner = lax.broadcasted_iota(jnp.int32, shape, len(shape) - 1).astype(jnp.uint32)
    mult = shape[-1]
    for ax in range(len(shape) - 2, 0, -1):
        inner = inner + (
            lax.broadcasted_iota(jnp.int32, shape, ax).astype(jnp.uint32)
            * jnp.uint32(mult)
        )
        mult *= shape[ax]
    row = lax.broadcasted_iota(jnp.int32, shape, 0).astype(jnp.uint32) + row_off_u32
    gidx = row * jnp.uint32(mult) + inner
    bits = _hash32(gidx ^ _hash32(seed_u32))
    thresh = jnp.uint32(min(int(round(p * 2.0 ** 32)), 2 ** 32 - 1))
    return bits >= thresh


def _apply_dropout(y, keep, p):
    # One select + one mul over the dense tile; math stays in y's dtype
    # (bf16 VALU exists on v6e/v7x; Mosaic handles the v5e upcast itself).
    scale = jnp.asarray(1.0 / (1.0 - p), y.dtype)
    zero = jnp.asarray(0.0, y.dtype)
    return y * jnp.where(keep, scale, zero)


# ----------------------------------------------------------------------------
# Kernels — dense 3D path: x blocked (bs, B, D), pe (bs, 1, D)
# ----------------------------------------------------------------------------
def _add_pe_3d_kernel(x_ref, pe_ref, o_ref):
    o_ref[...] = x_ref[...] + pe_ref[...]            # broadcast over batch


def _add_pe_dropout_3d_kernel(seed_ref, x_ref, pe_ref, o_ref, *, p, block_s):
    y = x_ref[...] + pe_ref[...]
    row_off = (pl.program_id(0) * block_s).astype(jnp.uint32)
    keep = _keep_mask(y.shape, row_off, seed_ref[0].astype(jnp.uint32), p)
    o_ref[...] = _apply_dropout(y, keep, p).astype(o_ref.dtype)


# ----------------------------------------------------------------------------
# Kernels — lane-folded 2D path: x viewed as (S, B*D), blocked (bs, B*D);
# pe blocked (bs, D), broadcast over batch with ONE lane concat (== jnp.tile),
# then a single dense add / select / store (no masked per-batch partial stores).
# ----------------------------------------------------------------------------
def _add_pe_2d_kernel(x_ref, pe_ref, o_ref, *, batch):
    pe = pe_ref[...]
    pe_b = pe if batch == 1 else jnp.concatenate([pe] * batch, axis=-1)
    o_ref[...] = x_ref[...] + pe_b


def _add_pe_dropout_2d_kernel(seed_ref, x_ref, pe_ref, o_ref, *, batch, p, block_s):
    pe = pe_ref[...]
    pe_b = pe if batch == 1 else jnp.concatenate([pe] * batch, axis=-1)
    y = x_ref[...] + pe_b
    row_off = (pl.program_id(0) * block_s).astype(jnp.uint32)
    keep = _keep_mask(y.shape, row_off, seed_ref[0].astype(jnp.uint32), p)
    o_ref[...] = _apply_dropout(y, keep, p).astype(o_ref.dtype)


# ----------------------------------------------------------------------------
# Tile-size / compiler-param policy
# ----------------------------------------------------------------------------
def _tpu_generation():
    try:
        kind = jax.devices()[0].device_kind.lower()
    except Exception:
        return 0
    for g in (7, 6, 5, 4):
        if f"v{g}" in kind:
            return g
    return 0


def _target_block_bytes(gen, training):
    # Pure streaming kernel: bigger tiles amortise the ~0.35 us fixed cost per
    # grid step.  Faster HBM generations get bigger tiles.
    if gen >= 7:
        tgt = 8 * _MIB
    elif gen == 6:
        tgt = 6 * _MIB
    elif gen == 5:
        tgt = 3 * _MIB
    else:
        tgt = 4 * _MIB
    if training:
        tgt //= 2        # budget the u32 bits + select temporaries in-body
    return tgt


def _choose_block_s(seq_len, row_bytes, granule, target_bytes, min_steps):
    rows = (target_bytes // max(row_bytes, 1)) // granule * granule
    rows = max(granule, rows)
    if rows >= seq_len:
        return seq_len                     # whole problem fits one tile
    if min_steps > 1:
        cap = -(-seq_len // min_steps)                       # ceil(S / min_steps)
        cap = max(granule, -(-cap // granule) * granule)     # round up to granule
        rows = min(rows, cap)
    return min(rows, seq_len)


def _vmem_limit_bytes(block_bytes, pe_block_bytes, training):
    resident = 4 * block_bytes + 2 * pe_block_bytes          # in+out, double-buffered
    if training:
        resident += 2 * block_bytes                          # in-body temporaries
    limit = int(resident * 1.5) + 4 * _MIB
    return max(32 * _MIB, min(48 * _MIB, limit))             # <= v7x 64 MiB physical


# ----------------------------------------------------------------------------
# Wrapper
# ----------------------------------------------------------------------------
def positional_encoding(x, pe, *, p: float = 0.1, training: bool = False,
                        seed: int = 0, block_s: int | None = None):
    """x: (S, B, D); pe: (max_len, 1, D). Returns dropout(x + pe[:S]) as (S, B, D).

    Note: vary `seed` per call/layer in training — identical seeds reuse masks.
    """
    S, B, D = x.shape
    assert pe.ndim == 3 and pe.shape[0] >= S and pe.shape[1] == 1 and pe.shape[2] == D
    assert 0.0 <= p < 1.0, "dropout p must be in [0, 1)"
    if pe.dtype != x.dtype:
        pe = pe.astype(x.dtype)

    itemsize = jnp.dtype(x.dtype).itemsize
    pack = max(8, 32 // itemsize)            # sublanes per vreg: f32 -> 8, bf16 -> 16
    use_dropout = training and p > 0.0
    gen = _tpu_generation()
    target = _target_block_bytes(gen, use_dropout)
    min_steps = 8 if gen >= 7 else 1         # give both v7x TensorCores >=4 steps
    row_bytes = B * D * itemsize

    # Use natural 3D blocking only when it is already sublane/lane dense;
    # otherwise fold batch into lanes: (S, B, D) -> (S, B*D) (free reshape).
    dense_3d = (D % 128 == 0) and (B % pack == 0)

    if dense_3d:
        bs = (_choose_block_s(S, row_bytes, 1, target, min_steps)
              if block_s is None else min(block_s, S))
        x_spec = pl.BlockSpec((bs, B, D), lambda i, *_: (i, 0, 0))
        pe_spec = pl.BlockSpec((bs, 1, D), lambda i, *_: (i, 0, 0))
        o_spec = pl.BlockSpec((bs, B, D), lambda i, *_: (i, 0, 0))
        out_shape = jax.ShapeDtypeStruct((S, B, D), x.dtype)
        kernel_eval = _add_pe_3d_kernel
        kernel_drop = functools.partial(_add_pe_dropout_3d_kernel, p=float(p), block_s=bs)
        x_in, pe_in = x, pe
        reshape_out = None
    else:
        x_in = x.reshape(S, B * D)                 # contiguous -> free
        pe_in = pe.reshape(pe.shape[0], D)         # (max_len, D), free
        if block_s is None:
            bs = _choose_block_s(S, row_bytes, pack, target, min_steps)
        else:
            bs = min(block_s, S)
            if bs < S:
                bs = max(pack, (bs // pack) * pack)    # keep (8,128)-tiling legality
        x_spec = pl.BlockSpec((bs, B * D), lambda i, *_: (i, 0))
        pe_spec = pl.BlockSpec((bs, D), lambda i, *_: (i, 0))
        o_spec = pl.BlockSpec((bs, B * D), lambda i, *_: (i, 0))
        out_shape = jax.ShapeDtypeStruct((S, B * D), x.dtype)
        kernel_eval = functools.partial(_add_pe_2d_kernel, batch=B)
        kernel_drop = functools.partial(_add_pe_dropout_2d_kernel,
                                        batch=B, p=float(p), block_s=bs)
        reshape_out = (S, B, D)

    grid = (pl.cdiv(S, bs),)
    block_bytes = bs * row_bytes
    pe_block_bytes = bs * D * itemsize
    cparams = pltpu.CompilerParams(
        dimension_semantics=("parallel",),
        vmem_limit_bytes=_vmem_limit_bytes(block_bytes, pe_block_bytes, use_dropout),
    )
    cost = pl.CostEstimate(
        flops=S * B * D * (3 if use_dropout else 1),
        transcendentals=0,
        bytes_accessed=2 * S * B * D * itemsize + S * D * itemsize,
    )

    if not use_dropout:
        out = pl.pallas_call(
            kernel_eval,
            out_shape=out_shape,
            grid_spec=pltpu.PrefetchScalarGridSpec(
                num_scalar_prefetch=0, grid=grid,
                in_specs=[x_spec, pe_spec], out_specs=o_spec),
            compiler_params=cparams,
            cost_estimate=cost,
        )(x_in, pe_in)
    else:
        # TODO(synk): dropout mask cannot match torch's RNG bit-for-bit; the
        # counter-hash PRNG reproduces the keep-prob / 1/(1-p) scaling semantics.
        seed_arr = jnp.asarray([seed], dtype=jnp.int32)
        out = pl.pallas_call(
            kernel_drop,
            out_shape=out_shape,
            grid_spec=pltpu.PrefetchScalarGridSpec(
                num_scalar_prefetch=1, grid=grid,
                in_specs=[x_spec, pe_spec], out_specs=o_spec),
            compiler_params=cparams,
            cost_estimate=cost,
        )(seed_arr, x_in, pe_in)

    return out if reshape_out is None else out.reshape(reshape_out)


# ----------------------------------------------------------------------------
# Demo / correctness check
# ----------------------------------------------------------------------------
if __name__ == "__main__":
    MAX_LEN = 64

    # 1) eval path, small batch / D % 128 != 0 -> lane-folded 2D layout
    S, B, D = 8, 2, 32
    x = jax.random.normal(jax.random.PRNGKey(0), (S, B, D), dtype=jnp.float32)
    pe = make_pe_buffer(MAX_LEN, D)
    ref = x + pe[:S]
    out = jax.block_until_ready(positional_encoding(x, pe, p=0.1, training=False))
    assert out.shape == (S, B, D)
    assert jnp.allclose(out, ref, atol=1e-6), "small-batch eval path mismatch"

    # 2) eval path, dense batch/embed -> natural 3D layout
    S2, B2, D2 = 16, 8, 128
    x_big = jax.random.normal(jax.random.PRNGKey(1), (S2, B2, D2), dtype=jnp.float32)
    pe_big = make_pe_buffer(MAX_LEN, D2)
    ref_big = x_big + pe_big[:S2]
    out_big = jax.block_until_ready(positional_encoding(x_big, pe_big, p=0.1, training=False))
    assert jnp.allclose(out_big, ref_big, atol=1e-6), "large-batch eval path mismatch"

    # 3) training path: inverted dropout (each element is 0 or ref/(1-p))
    p = 0.1
    scale = 1.0 / (1.0 - p)

    out_tr = jax.block_until_ready(
        positional_encoding(x, pe, p=p, training=True, seed=123))
    kept_ok = jnp.abs(out_tr - ref * scale) < 1e-5
    dropped = out_tr == 0.0
    assert bool(jnp.all(kept_ok | dropped)), "2D dropout path produced unexpected values"

    out_tr_big = jax.block_until_ready(
        positional_encoding(x_big, pe_big, p=p, training=True, seed=7))
    kept_ok_b = jnp.abs(out_tr_big - ref_big * scale) < 1e-5
    dropped_b = out_tr_big == 0.0
    assert bool(jnp.all(kept_ok_b | dropped_b)), "3D dropout path produced unexpected values"

    print("KERNEL_OK")
</pallas_src>

<mosaic_0001>
module attributes {stable_mosaic.version = 11 : i64} {
  func.func @_add_pe_2d_kernel(%arg0: i32, %arg1: memref<8x64xf32, #tpu.memory_space<vmem>>, %arg2: memref<8x32xf32, #tpu.memory_space<vmem>>, %arg3: memref<8x64xf32, #tpu.memory_space<vmem>>) attributes {dimension_semantics = [#tpu.dimension_semantics<parallel>], iteration_bounds = array<i64: 1>, scalar_prefetch = 0 : i64, scratch_operands = 0 : i64, tpu.core_type = #tpu.core_type<tc>, window_params = [{transform_indices = @transform_0, window_bounds = array<i64: 8, 64>}, {transform_indices = @transform_1, window_bounds = array<i64: 8, 32>}, {transform_indices = @transform_2, window_bounds = array<i64: 8, 64>}]} {
    %c0 = arith.constant 0 : index
    %c0_0 = arith.constant 0 : index
    %0 = vector.load %arg2[%c0, %c0_0] : memref<8x32xf32, #tpu.memory_space<vmem>>, vector<8x32xf32>
    %1 = tpu.concatenate %0, %0 in 1 : vector<8x32xf32>, vector<8x32xf32> -> vector<8x64xf32>
    %c0_1 = arith.constant 0 : index
    %c0_2 = arith.constant 0 : index
    %2 = vector.load %arg1[%c0_1, %c0_2] : memref<8x64xf32, #tpu.memory_space<vmem>>, vector<8x64xf32>
    %3 = arith.addf %2, %1 : vector<8x64xf32>
    %c0_3 = arith.constant 0 : index
    %c0_4 = arith.constant 0 : index
    %4 = vector.load %arg3[%c0_3, %c0_4] : memref<8x64xf32, #tpu.memory_space<vmem>>, vector<8x64xf32>
    tpu.vector_store %arg3[%c0_3, %c0_4], %3 {strides = array<i32>} : memref<8x64xf32, #tpu.memory_space<vmem>>, vector<8x64xf32>,
    return
  }
  func.func @transform_0(%arg0: i32) -> (i32, i32) {
    %c0_i32 = arith.constant 0 : i32
    %c0_i32_0 = arith.constant 0 : i32
    return %arg0, %c0_i32 : i32, i32
  }
  func.func @transform_1(%arg0: i32) -> (i32, i32) {
    %c0_i32 = arith.constant 0 : i32
    %c0_i32_0 = arith.constant 0 : i32
    return %arg0, %c0_i32 : i32, i32
  }
  func.func @transform_2(%arg0: i32) -> (i32, i32) {
    %c0_i32 = arith.constant 0 : i32
    %c0_i32_0 = arith.constant 0 : i32
    return %arg0, %c0_i32 : i32, i32
  }
}

</mosaic_0001>

<bundles_post_ra>
// kernel: tpu_custom_call.1
= control target key start
LH: loop header
LB: loop body
LE: loop exit
PB: predicated region body
PF: predicated region fallthrough
CT: control target
= control target key end

     0   :  { %s93_s0 = inlined_call_operand.vmem [shape: f32[8,64], index: 0, kind: input, shape index: {}]   ;;  %s94_s1 = inlined_call_operand.vmem [shape: f32[64,32], index: 1, kind: input, shape index: {}]   ;;  %s95_s2 = inlined_call_operand.hbm [shape: f32[8,64], index: 2, kind: output, shape index: {}]  }
   0x1   :  { %v12_v0 = vld [vmem:[%s94_s1] sm:$0xff] }
   0x2   :  { %7 = vsyncpa [#allocation3], 0  ;;  %s67_s11 = smov 32   ;;  %vm17_vm0 = vcmask 261120   ;;  %v19_v1 = vld [vmem:[%s93_s0] sm:$0xff]  ;;  %s68_s14 = smov [#allocation2]  }
   0x3   :  { %14 = vrot.lane.b32.xlu0 %v12_v0, %s67_s11  ;;  %s28_s15 = sshll.u32 %s68_s14, 4  ;;  %s30_s18 = sshll.u32 %s95_s2, 4  ;;  %vm21_vm1 = vcmask 523264   ;;  %s29_s15 = int_to_ptr.vmem [resolvable:$true] %s28_s15  ;;  %s31_s18 = int_to_ptr.hbm [resolvable:$true] %s30_s18 }
  0x75   :  { %v15_v2 = vpop.permute.xlu0 %14 }
  0x76   :  { %v18_v3 = vsel %vm17_vm0, %v12_v0, %v15_v2 }
  0x77   :  { %v20_v4 = vadd.f32 %v19_v1, %v18_v3 }
  0x79   :  { %22 = vst.msk [vmem:[#allocation2] sm:$0xff] %vm21_vm1, %v20_v4 }
  0x7a   :  { %33 = dma.vmem_to_hbm [thread:$0]  %s29_s15, 128, %s31_s18, [#allocation3]  }
  0x7b   :  { %65 = dma.done.wait [#allocation3], 128  }
  0x7c   :  { %66 = vsyncadd [#allocation3], 4294967168 }
  0x7d   :  { %38 = vsyncpa [#allocation3], 1 }

</bundles_post_ra>
